<compile_context>
chip_gen: v5e
topology: v5e:2x2
jax: 0.10.0
libtpu: 0.0.40
codegen_flags: <defaults>
</compile_context>

<pallas_src>
import functools

import jax
import jax.numpy as jnp
from jax import lax
from jax.experimental import pallas as pl
from jax.experimental.pallas import tpu as pltpu

IGNORED_LOGITS_VALUE = -3000.0


def _round_up(x, m):
    return (x + m - 1) // m * m


def _cumsum_lastdim(x):
    """Inclusive prefix-sum along the last dim of a (B, K) array.

    Implemented as one (B,K)@(K,K) triangular matmul so it runs on the MXU
    (idle in this kernel) instead of building a (B,K,K) VPU/XLU temporary.
    """
    k = x.shape[-1]
    src = lax.broadcasted_iota(jnp.int32, (k, k), 0)   # j (source position)
    dst = lax.broadcasted_iota(jnp.int32, (k, k), 1)   # i (output position)
    tri = (src <= dst).astype(jnp.float32)             # tri[j, i] = 1 iff j <= i
    return jnp.dot(x, tri, preferred_element_type=jnp.float32)


def _multinomial_sample_kernel(logits_ref, sp_ref, seed_ref, out_ref,
                               cand_val_ref, cand_idx_ref, *,
                               cand_k, vocab_size, deterministic):
    K = cand_k
    v_blk = pl.program_id(0)
    n_blk = pl.num_programs(0)

    # Load the block in its native dtype and cast once (no wrapper-side cast).
    x = logits_ref[...].astype(jnp.float32)              # (B, TV)
    B, TV = x.shape
    bpos = lax.broadcasted_iota(jnp.int32, (B, TV), 1)   # position within block
    kpos = lax.broadcasted_iota(jnp.int32, (B, K), 1)    # candidate position
    gidx0 = v_blk * TV                                    # global id of block start
    # Mask out-of-vocab lanes (no wrapper-side pad; also guarantees no token >= V).
    x = jnp.where(gidx0 + bpos < vocab_size, x, -jnp.inf)

    @pl.when(v_blk == 0)
    def _():
        cand_val_ref[...] = jnp.full((B, K), -jnp.inf, dtype=jnp.float32)
        cand_idx_ref[...] = jnp.zeros((B, K), dtype=jnp.int32)

    # ---- threshold-gated, dynamic-trip streaming top-K merge --------------------
    # Current K-th best per row; count how many block entries beat it.  Ties keep
    # the earlier vocab id (matches stable descending sort), so strict '>' is right.
    thresh = cand_val_ref[:, K - 1:K]                                        # (B, 1)
    n_per_row = jnp.sum((x > thresh).astype(jnp.int32), axis=1, keepdims=True)
    n_iters = jnp.minimum(jnp.max(n_per_row), K)          # scalar dynamic trip count

    @pl.when(n_iters > 0)
    def _():
        def insert_one(_, carry):
            cv, ci, bv = carry
            # best remaining block element (stable: first occurrence of the max)
            mb = jnp.max(bv, axis=1, keepdims=True)                           # (B,1)
            first_b = jnp.min(jnp.where(bv == mb, bpos, TV), axis=1, keepdims=True)
            new_idx = gidx0 + first_b                                         # (B,1)
            # insertion position in the sorted candidate list (ties: old wins)
            rank = jnp.sum((cv >= mb).astype(jnp.int32), axis=1, keepdims=True)
            # shift-right by one from `rank` on (last candidate falls off);
            # rank == K is a clean no-op for rows already done.
            cv_r = jnp.roll(cv, 1, axis=1)
            ci_r = jnp.roll(ci, 1, axis=1)
            cv = jnp.where(kpos < rank, cv, jnp.where(kpos == rank, mb, cv_r))
            ci = jnp.where(kpos < rank, ci, jnp.where(kpos == rank, new_idx, ci_r))
            bv = jnp.where(bpos == first_b, -jnp.inf, bv)   # consume the element
            return cv, ci, bv

        cv, ci, _ = lax.fori_loop(
            0, n_iters, insert_one,
            (cand_val_ref[...], cand_idx_ref[...], x))
        cand_val_ref[...] = cv
        cand_idx_ref[...] = ci

    # ---- last vocab block: top-k mask / temperature / top-p / multinomial -------
    @pl.when(v_blk == n_blk - 1)
    def _():
        svals = cand_val_ref[...]                          # (B, K) descending, stable
        sidx = cand_idx_ref[...]
        top_k = sp_ref[:, 0:1].astype(jnp.float32)         # (B, 1)
        top_p = sp_ref[:, 1:2].astype(jnp.float32)
        temperature = sp_ref[:, 2:3].astype(jnp.float32)

        # top-k mask on the sorted candidates, then temperature (dynamic path).
        svals = jnp.where(kpos.astype(jnp.float32) >= top_k,
                          IGNORED_LOGITS_VALUE, svals)
        svals = svals / temperature

        # softmax over the K candidates (the vocab tail beyond K carries ~0 mass
        # because the reference masks it to IGNORED_LOGITS_VALUE anyway).
        mx = jnp.max(svals, axis=1, keepdims=True)
        e = jnp.exp(svals - mx)
        probs = e / jnp.sum(e, axis=1, keepdims=True)      # (B, K)

        cums = _cumsum_lastdim(probs)                      # MXU cumsum
        # torch.min(probs_cumsum) is a whole-batch global min; rows are
        # non-decreasing, so it's the sublane min of the first cumsum column.
        gmin = jnp.min(cums[:, 0:1], axis=0, keepdims=True)        # (1, 1)
        top_p_eff = jnp.maximum(gmin, top_p)                       # (B, 1)
        keep = jnp.logical_not((cums > top_p_eff) & (kpos > 0))    # index 0 always kept

        # fused "second softmax": renormalize kept probabilities, exact division
        # (avoids approx-reciprocal error at the 0.5 bin boundary).
        kept = jnp.where(keep, probs, 0.0)
        s = _cumsum_lastdim(kept)
        cums2 = s / s[:, K - 1:K]

        if deterministic:
            rand = jnp.full((B, 1), 0.5, dtype=jnp.float32)
        else:
            # uniform [0, 1); RNG stream differs from the torch/xla Rng op.
            pltpu.prng_seed(seed_ref[0])
            bits = pltpu.bitcast(pltpu.prng_random_bits((B, 128)), jnp.uint32)
            rand = (bits[:, 0:1] >> jnp.uint32(8)).astype(jnp.float32) * (1.0 / (1 << 24))

        counts = jnp.sum((rand > cums2).astype(jnp.int32), axis=1, keepdims=True)
        counts = jnp.minimum(counts, K - 1)                # FP guard: never index past K-1
        token = jnp.sum(jnp.where(kpos == counts, sidx, 0), axis=1, keepdims=True)
        out_ref[...] = token.astype(jnp.int32)


def _argmax_kernel(logits_ref, out_ref, best_val_ref, best_idx_ref, *, vocab_size):
    # greedy path (nxd_argmax equivalent on a single core): first index of the max,
    # streamed over vocab blocks with a (B, 1) running best in VMEM scratch.
    v_blk = pl.program_id(0)
    n_blk = pl.num_programs(0)
    x = logits_ref[...].astype(jnp.float32)
    B, TV = x.shape
    bpos = lax.broadcasted_iota(jnp.int32, (B, TV), 1)
    gidx = v_blk * TV + bpos
    x = jnp.where(gidx < vocab_size, x, -jnp.inf)          # mask OOB lanes in-kernel

    @pl.when(v_blk == 0)
    def _():
        best_val_ref[...] = jnp.full((B, 1), -jnp.inf, dtype=jnp.float32)
        best_idx_ref[...] = jnp.zeros((B, 1), dtype=jnp.int32)

    blk_max = jnp.max(x, axis=1, keepdims=True)
    blk_arg = jnp.min(jnp.where(x == blk_max, gidx, jnp.iinfo(jnp.int32).max),
                      axis=1, keepdims=True)
    better = blk_max > best_val_ref[...]                   # strict: keep first occurrence
    best_idx_ref[...] = jnp.where(better, blk_arg, best_idx_ref[...])
    best_val_ref[...] = jnp.where(better, blk_max, best_val_ref[...])

    @pl.when(v_blk == n_blk - 1)
    def _():
        out_ref[...] = best_idx_ref[...]


class PallasSampler:
    """JAX/Pallas re-implementation of Sampler.forward (on-device sampling path)."""

    def __init__(self, do_sample=True, dynamic=True, deterministic=True,
                 global_topk=0, max_top_k=64, vocab_block_size=None):
        # TODO(synk): global_topk > 0 uses the distributed nxd_topk collective; a
        # single-core streaming top-K is used instead (identical semantics on 1 device).
        assert global_topk == 0
        self.do_sample = do_sample
        self.dynamic = dynamic
        self.deterministic = deterministic
        # Candidate width kept 128-lane aligned; exact equivalence to the reference
        # requires per-row top_k <= cand_k (tail beyond the top-k cut carries only
        # exp(-3000/T) ~ 0 probability mass either way).
        self.cand_k = _round_up(max(int(max_top_k), 1), 128)
        self.vocab_block_size = vocab_block_size

    def _pick_block(self, batch, vocab):
        if self.vocab_block_size is None:
            # Keep the merge-loop (B, tv) f32 carry within ~16 vregs (64 KiB) so the
            # dynamic insertion loop never spills; larger batch -> narrower block.
            tv = max(512, min(8192, (16384 // max(batch, 1)) // 128 * 128))
        else:
            tv = _round_up(max(int(self.vocab_block_size), 128), 128)
        return min(tv, _round_up(vocab, 128))

    def __call__(self, token_logits, sampling_params, seed=0):
        B, V = token_logits.shape
        tv = self._pick_block(B, V)
        n_blk = pl.cdiv(V, tv)                      # no wrapper-side pad: OOB lanes masked in-kernel

        compiler_params = pltpu.CompilerParams(
            dimension_semantics=("arbitrary",),      # candidate scratch carried across blocks
            vmem_limit_bytes=32 * 1024 * 1024)

        if self.do_sample and self.dynamic:
            kernel = functools.partial(_multinomial_sample_kernel,
                                       cand_k=self.cand_k,
                                       vocab_size=V,
                                       deterministic=self.deterministic)
            out = pl.pallas_call(
                kernel,
                grid=(n_blk,),
                in_specs=[
                    pl.BlockSpec((B, tv), lambda v: (0, v)),     # pipelined vocab blocks (native dtype)
                    pl.BlockSpec((B, sampling_params.shape[1]), lambda v: (0, 0)),
                    pl.BlockSpec(memory_space=pltpu.MemorySpace.SMEM),   # seed
                ],
                out_specs=pl.BlockSpec((B, 1), lambda v: (0, 0)),
                out_shape=jax.ShapeDtypeStruct((B, 1), jnp.int32),
                scratch_shapes=[
                    pltpu.VMEM((B, self.cand_k), jnp.float32),   # running top-K values
                    pltpu.VMEM((B, self.cand_k), jnp.int32),     # running top-K vocab ids
                ],
                compiler_params=compiler_params,
            )(token_logits, sampling_params, jnp.asarray([seed], dtype=jnp.int32))
            return out.reshape(B)
        else:
            # TODO(synk): the non-dynamic path's torch.any(top_k > 1) is data-dependent;
            # it is treated here as the static greedy/argmax configuration.
            kernel = functools.partial(_argmax_kernel, vocab_size=V)
            out = pl.pallas_call(
                kernel,
                grid=(n_blk,),
                in_specs=[pl.BlockSpec((B, tv), lambda v: (0, v))],
                out_specs=pl.BlockSpec((B, 1), lambda v: (0, 0)),
                out_shape=jax.ShapeDtypeStruct((B, 1), jnp.int32),
                scratch_shapes=[
                    pltpu.VMEM((B, 1), jnp.float32),
                    pltpu.VMEM((B, 1), jnp.int32),
                ],
                compiler_params=compiler_params,
            )(token_logits)
            return out.reshape(B)


def _reference_multinomial_deterministic(logits, sp):
    """Pure-JAX mirror of Sampler._multinomial_sample (dynamic, rand=0.5)."""
    logits = logits.astype(jnp.float32)
    B, V = logits.shape
    top_k = sp[:, 0:1]
    top_p = sp[:, 1:2]
    temperature = sp[:, 2:3]
    order = jnp.argsort(-logits, axis=-1)                       # stable descending
    svals = jnp.take_along_axis(logits, order, axis=-1)
    pos = jnp.arange(V, dtype=jnp.float32)[None, :]
    svals = jnp.where(pos >= top_k, IGNORED_LOGITS_VALUE, svals)
    svals = svals / temperature
    probs = jax.nn.softmax(svals, axis=-1)
    cums = jnp.cumsum(probs, axis=-1)
    top_p_eff = jnp.maximum(jnp.min(cums), top_p)
    mask = (cums > top_p_eff).at[:, 0].set(False)
    svals = jnp.where(mask, IGNORED_LOGITS_VALUE, svals)
    probs = jax.nn.softmax(svals, axis=-1)
    cums2 = jnp.cumsum(probs, axis=-1)
    counts = jnp.sum((0.5 > cums2).astype(jnp.int32), axis=-1, keepdims=True)
    return jnp.take_along_axis(order, counts, axis=-1).reshape(-1).astype(jnp.int32)


if __name__ == "__main__":
    key = jax.random.PRNGKey(0)
    B, V = 4, 500                      # V not a multiple of the block -> exercises OOB masking
    token_logits = jax.random.normal(key, (B, V), dtype=jnp.float32)
    # per-batch [top_k, top_p, temperature]
    sampling_params = jnp.array(
        [[1.0, 1.0, 1.0],
         [5.0, 0.9, 0.7],
         [10.0, 0.5, 1.0],
         [50.0, 1.0, 2.0]], dtype=jnp.float32)

    # multinomial (top-k / top-p / temperature) path, deterministic rand-selector = 0.5,
    # 2 vocab blocks so the threshold-gated streaming merge across blocks is exercised.
    sampler = PallasSampler(do_sample=True, dynamic=True, deterministic=True,
                            max_top_k=64, vocab_block_size=256)
    tokens = jax.block_until_ready(sampler(token_logits, sampling_params))
    assert tokens.shape == (B,)
    assert tokens.dtype == jnp.int32
    assert bool(jnp.all((tokens >= 0) & (tokens < V)))

    argmax_ref = jnp.argmax(token_logits, axis=-1).astype(jnp.int32)
    # row 0 uses top_k = 1 -> must reduce to greedy argmax
    assert int(tokens[0]) == int(argmax_ref[0])
    # every sampled token must come from its row's top-k candidate set
    for b in range(B):
        k = int(sampling_params[b, 0])
        _, topk_idx = jax.lax.top_k(token_logits[b], k)
        assert int(tokens[b]) in {int(t) for t in topk_idx}

    # Exact match vs a pure-JAX mirror of the torch pipeline for rows whose
    # top-p threshold is below 1.0 (for top_p == 1.0 the mask depends on whether
    # the f32 cumsum tail rounds above/below 1.0, an FP coin flip in the torch
    # reference as well).
    ref_tokens = _reference_multinomial_deterministic(token_logits, sampling_params)
    for b in range(B):
        if float(sampling_params[b, 1]) < 1.0 or float(sampling_params[b, 0]) <= 1.0:
            assert int(tokens[b]) == int(ref_tokens[b]), (b, tokens, ref_tokens)

    # auto vocab-block sizing (single block) must agree bitwise with the 2-block run
    sampler_auto = PallasSampler(do_sample=True, dynamic=True, deterministic=True,
                                 max_top_k=64)
    tokens_auto = jax.block_until_ready(sampler_auto(token_logits, sampling_params))
    assert bool(jnp.array_equal(tokens_auto, tokens))

    # bf16 logits path (no wrapper-side pad/cast; in-kernel cast once per block)
    logits_bf16 = token_logits.astype(jnp.bfloat16)
    tokens_bf16 = jax.block_until_ready(sampler(logits_bf16, sampling_params))
    assert bool(jnp.all((tokens_bf16 >= 0) & (tokens_bf16 < V)))
    assert int(tokens_bf16[0]) == int(jnp.argmax(logits_bf16.astype(jnp.float32)[0]))

    # greedy (argmax) path, verified exactly against a pure-JAX reference
    greedy = PallasSampler(do_sample=False, dynamic=False, deterministic=True,
                           vocab_block_size=256)
    gtok = jax.block_until_ready(greedy(token_logits, sampling_params))
    assert bool(jnp.array_equal(gtok, argmax_ref))

    print("KERNEL_OK")
</pallas_src>

<mosaic_0001>
module attributes {stable_mosaic.version = 11 : i64} {
  func.func @_multinomial_sample_kernel(%arg0: i32, %arg1: memref<4x256xf32, #tpu.memory_space<vmem>>, %arg2: memref<4x3xf32, #tpu.memory_space<vmem>>, %arg3: memref<1xi32, #tpu.memory_space<smem>>, %arg4: memref<4x1xi32, #tpu.memory_space<vmem>>, %arg5: memref<4x128xf32, #tpu.memory_space<vmem>>, %arg6: memref<4x128xi32, #tpu.memory_space<vmem>>) attributes {dimension_semantics = [#tpu.dimension_semantics<arbitrary>], iteration_bounds = array<i64: 2>, scalar_prefetch = 0 : i64, scratch_operands = 2 : i64, tpu.core_type = #tpu.core_type<tc>, window_params = [{transform_indices = @transform_0, window_bounds = array<i64: 4, 256>}, {pipeline_mode = #tpu.pipeline_mode<synchronous>, transform_indices = @transform_1, window_bounds = array<i64: 4, 3>}, {transform_indices = @transform_2, window_bounds = array<i64: 1>}, {pipeline_mode = #tpu.pipeline_mode<synchronous>, transform_indices = @transform_3, window_bounds = array<i64: 4, 1>}]} {
    %c0 = arith.constant 0 : index
    %c0_0 = arith.constant 0 : index
    %0 = vector.load %arg1[%c0, %c0_0] : memref<4x256xf32, #tpu.memory_space<vmem>>, vector<4x256xf32>
    %1 = tpu.iota {dimensions = array<i32: 1>} : vector<4x256xi32>
    %2 = tpu.iota {dimensions = array<i32: 1>} : vector<4x128xi32>
    %c256_i32 = arith.constant 256 : i32
    %3 = arith.muli %arg0, %c256_i32 : i32
    %4 = vector.broadcast %3 : i32 to vector<4x256xi32>
    %5 = arith.addi %4, %1 : vector<4x256xi32>
    %c500_i32 = arith.constant 500 : i32
    %6 = vector.broadcast %c500_i32 : i32 to vector<4x256xi32>
    %7 = arith.cmpi slt, %5, %6 : vector<4x256xi32>
    %cst = arith.constant 0xFF800000 : f32
    %8 = vector.broadcast %cst : f32 to vector<4x256xf32>
    %9 = arith.select %7, %0, %8 : vector<4x256xi1>, vector<4x256xf32>
    %c0_i32 = arith.constant 0 : i32
    %10 = arith.cmpi eq, %arg0, %c0_i32 : i32
    %11 = arith.extui %10 : i1 to i32
    %c0_i32_1 = arith.constant 0 : i32
    %12 = arith.cmpi ne, %11, %c0_i32_1 : i32
    scf.if %12 {
      %cst_8 = arith.constant 0xFF800000 : f32
      %30 = vector.broadcast %cst_8 : f32 to vector<4x128xf32>
      %c0_9 = arith.constant 0 : index
      %c0_10 = arith.constant 0 : index
      %31 = vector.load %arg5[%c0_9, %c0_10] : memref<4x128xf32, #tpu.memory_space<vmem>>, vector<4x128xf32>
      tpu.vector_store %arg5[%c0_9, %c0_10], %30 {strides = array<i32>} : memref<4x128xf32, #tpu.memory_space<vmem>>, vector<4x128xf32>,
      %c0_i32_11 = arith.constant 0 : i32
      %32 = vector.broadcast %c0_i32_11 : i32 to vector<4x128xi32>
      %c0_12 = arith.constant 0 : index
      %c0_13 = arith.constant 0 : index
      %33 = vector.load %arg6[%c0_12, %c0_13] : memref<4x128xi32, #tpu.memory_space<vmem>>, vector<4x128xi32>
      tpu.vector_store %arg6[%c0_12, %c0_13], %32 {strides = array<i32>} : memref<4x128xi32, #tpu.memory_space<vmem>>, vector<4x128xi32>,
    } else {
    }
    %c0_2 = arith.constant 0 : index
    %c127 = arith.constant 127 : index
    %13 = vector.load %arg5[%c0_2, %c127] : memref<4x128xf32, #tpu.memory_space<vmem>>, vector<4x1xf32>
    %14 = vector.broadcast %13 : vector<4x1xf32> to vector<4x256xf32>
    %15 = arith.cmpf ogt, %9, %14 : vector<4x256xf32>
    %16 = arith.extui %15 : vector<4x256xi1> to vector<4x256xi32>
    %cst_3 = arith.constant dense<0> : vector<4xi32>
    %17 = vector.multi_reduction <add>, %16, %cst_3 [1] : vector<4x256xi32> to vector<4xi32>
    %18 = vector.shape_cast %17 : vector<4xi32> to vector<4x1xi32>
    %19 = vector.shape_cast %18 : vector<4x1xi32> to vector<1x4x1xi32>
    %cst_4 = arith.constant dense<-2147483648> : vector<1xi32>
    %20 = vector.multi_reduction <maxsi>, %19, %cst_4 [1, 2] : vector<1x4x1xi32> to vector<1xi32>
    %21 = vector.shape_cast %20 : vector<1xi32> to vector<1x1x1xi32>
    %22 = vector.extract %21[0, 0, 0] : i32 from vector<1x1x1xi32>
    %c128_i32 = arith.constant 128 : i32
    %23 = arith.minsi %22, %c128_i32 : i32
    %c0_i32_5 = arith.constant 0 : i32
    %24 = arith.cmpi sgt, %23, %c0_i32_5 : i32
    %25 = arith.extui %24 : i1 to i32
    %c0_i32_6 = arith.constant 0 : i32
    %26 = arith.cmpi ne, %25, %c0_i32_6 : i32
    scf.if %26 {
      %c0_8 = arith.constant 0 : index
      %c0_9 = arith.constant 0 : index
      %30 = vector.load %arg5[%c0_8, %c0_9] : memref<4x128xf32, #tpu.memory_space<vmem>>, vector<4x128xf32>
      %c0_10 = arith.constant 0 : index
      %c0_11 = arith.constant 0 : index
      %31 = vector.load %arg6[%c0_10, %c0_11] : memref<4x128xi32, #tpu.memory_space<vmem>>, vector<4x128xi32>
      %c0_i32_12 = arith.constant 0 : i32
      %32 = arith.subi %23, %c0_i32_12 : i32
      %33 = arith.addi %c0_i32_12, %32 : i32
      %c1_i32_13 = arith.constant 1 : i32
      %34:3 = scf.for %arg7 = %c0_i32_12 to %33 step %c1_i32_13 iter_args(%arg8 = %30, %arg9 = %31, %arg10 = %9) -> (vector<4x128xf32>, vector<4x128xi32>, vector<4x256xf32>)  : i32 {
        %cst_18 = arith.constant dense<0xFF800000> : vector<4xf32>
        %37 = vector.multi_reduction <maximumf>, %arg10, %cst_18 [1] : vector<4x256xf32> to vector<4xf32>
        %38 = vector.shape_cast %37 : vector<4xf32> to vector<4x1xf32>
        %39 = vector.broadcast %38 : vector<4x1xf32> to vector<4x256xf32>
        %40 = arith.cmpf oeq, %arg10, %39 : vector<4x256xf32>
        %c256_i32_19 = arith.constant 256 : i32
        %41 = vector.broadcast %c256_i32_19 : i32 to vector<4x256xi32>
        %42 = arith.select %40, %1, %41 : vector<4x256xi1>, vector<4x256xi32>
        %cst_20 = arith.constant dense<2147483647> : vector<4xi32>
        %43 = vector.multi_reduction <minsi>, %42, %cst_20 [1] : vector<4x256xi32> to vector<4xi32>
        %44 = vector.shape_cast %43 : vector<4xi32> to vector<4x1xi32>
        %45 = vector.broadcast %3 : i32 to vector<4x1xi32>
        %46 = arith.addi %45, %44 : vector<4x1xi32>
        %47 = vector.broadcast %38 : vector<4x1xf32> to vector<4x128xf32>
        %48 = arith.cmpf oge, %arg8, %47 : vector<4x128xf32>
        %49 = arith.extui %48 : vector<4x128xi1> to vector<4x128xi32>
        %cst_21 = arith.constant dense<0> : vector<4xi32>
        %50 = vector.multi_reduction <add>, %49, %cst_21 [1] : vector<4x128xi32> to vector<4xi32>
        %51 = vector.shape_cast %50 : vector<4xi32> to vector<4x1xi32>
        %52 = vector.extract_strided_slice %arg8 {offsets = [0, 127], sizes = [4, 1], strides = [1, 1]} : vector<4x128xf32> to vector<4x1xf32>
        %53 = vector.extract_strided_slice %arg8 {offsets = [0, 0], sizes = [4, 127], strides = [1, 1]} : vector<4x128xf32> to vector<4x127xf32>
        %54 = tpu.concatenate %52, %53 in 1 : vector<4x1xf32>, vector<4x127xf32> -> vector<4x128xf32>
        %55 = vector.extract_strided_slice %arg9 {offsets = [0, 127], sizes = [4, 1], strides = [1, 1]} : vector<4x128xi32> to vector<4x1xi32>
        %56 = vector.extract_strided_slice %arg9 {offsets = [0, 0], sizes = [4, 127], strides = [1, 1]} : vector<4x128xi32> to vector<4x127xi32>
        %57 = tpu.concatenate %55, %56 in 1 : vector<4x1xi32>, vector<4x127xi32> -> vector<4x128xi32>
        %58 = vector.broadcast %51 : vector<4x1xi32> to vector<4x128xi32>
        %59 = arith.cmpi slt, %2, %58 : vector<4x128xi32>
        %60 = vector.broadcast %51 : vector<4x1xi32> to vector<4x128xi32>
        %61 = arith.cmpi eq, %2, %60 : vector<4x128xi32>
        %62 = vector.shape_cast %38 : vector<4x1xf32> to vector<4x1xf32>
        %63 = vector.broadcast %62 : vector<4x1xf32> to vector<4x128xf32>
        %64 = arith.select %61, %63, %54 : vector<4x128xi1>, vector<4x128xf32>
        %65 = arith.select %59, %arg8, %64 : vector<4x128xi1>, vector<4x128xf32>
        %66 = vector.broadcast %51 : vector<4x1xi32> to vector<4x128xi32>
        %67 = arith.cmpi slt, %2, %66 : vector<4x128xi32>
        %68 = vector.broadcast %51 : vector<4x1xi32> to vector<4x128xi32>
        %69 = arith.cmpi eq, %2, %68 : vector<4x128xi32>
        %70 = vector.shape_cast %46 : vector<4x1xi32> to vector<4x1xi32>
        %71 = vector.broadcast %70 : vector<4x1xi32> to vector<4x128xi32>
        %72 = arith.select %69, %71, %57 : vector<4x128xi1>, vector<4x128xi32>
        %73 = arith.select %67, %arg9, %72 : vector<4x128xi1>, vector<4x128xi32>
        %74 = vector.broadcast %44 : vector<4x1xi32> to vector<4x256xi32>
        %75 = arith.cmpi eq, %1, %74 : vector<4x256xi32>
        %cst_22 = arith.constant 0xFF800000 : f32
        %76 = vector.broadcast %cst_22 : f32 to vector<4x256xf32>
        %77 = arith.select %75, %76, %arg10 : vector<4x256xi1>, vector<4x256xf32>
        scf.yield %65, %73, %77 : vector<4x128xf32>, vector<4x128xi32>, vector<4x256xf32>
      }
      %c0_14 = arith.constant 0 : index
      %c0_15 = arith.constant 0 : index
      %35 = vector.load %arg5[%c0_14, %c0_15] : memref<4x128xf32, #tpu.memory_space<vmem>>, vector<4x128xf32>
      tpu.vector_store %arg5[%c0_14, %c0_15], %34#0 {strides = array<i32>} : memref<4x128xf32, #tpu.memory_space<vmem>>, vector<4x128xf32>,
      %c0_16 = arith.constant 0 : index
      %c0_17 = arith.constant 0 : index
      %36 = vector.load %arg6[%c0_16, %c0_17] : memref<4x128xi32, #tpu.memory_space<vmem>>, vector<4x128xi32>
      tpu.vector_store %arg6[%c0_16, %c0_17], %34#1 {strides = array<i32>} : memref<4x128xi32, #tpu.memory_space<vmem>>, vector<4x128xi32>,
    } else {
    }
    %c1_i32 = arith.constant 1 : i32
    %27 = arith.cmpi eq, %arg0, %c1_i32 : i32
    %28 = arith.extui %27 : i1 to i32
    %c0_i32_7 = arith.constant 0 : i32
    %29 = arith.cmpi ne, %28, %c0_i32_7 : i32
    scf.if %29 {
      %c0_8 = arith.constant 0 : index
      %c0_9 = arith.constant 0 : index
      %30 = vector.load %arg5[%c0_8, %c0_9] : memref<4x128xf32, #tpu.memory_space<vmem>>, vector<4x128xf32>
      %c0_10 = arith.constant 0 : index
      %c0_11 = arith.constant 0 : index
      %31 = vector.load %arg6[%c0_10, %c0_11] : memref<4x128xi32, #tpu.memory_space<vmem>>, vector<4x128xi32>
      %c0_12 = arith.constant 0 : index
      %c0_13 = arith.constant 0 : index
      %32 = vector.load %arg2[%c0_12, %c0_13] : memref<4x3xf32, #tpu.memory_space<vmem>>, vector<4x1xf32>
      %c0_14 = arith.constant 0 : index
      %c1 = arith.constant 1 : index
      %33 = vector.load %arg2[%c0_14, %c1] : memref<4x3xf32, #tpu.memory_space<vmem>>, vector<4x1xf32>
      %c0_15 = arith.constant 0 : index
      %c2 = arith.constant 2 : index
      %34 = vector.load %arg2[%c0_15, %c2] : memref<4x3xf32, #tpu.memory_space<vmem>>, vector<4x1xf32>
      %35 = arith.sitofp %2 : vector<4x128xi32> to vector<4x128xf32>
      %36 = vector.broadcast %32 : vector<4x1xf32> to vector<4x128xf32>
      %37 = arith.cmpf oge, %35, %36 : vector<4x128xf32>
      %cst_16 = arith.constant -3.000000e+03 : f32
      %38 = vector.broadcast %cst_16 : f32 to vector<4x128xf32>
      %39 = arith.select %37, %38, %30 : vector<4x128xi1>, vector<4x128xf32>
      %40 = vector.broadcast %34 : vector<4x1xf32> to vector<4x128xf32>
      %41 = arith.divf %39, %40 : vector<4x128xf32>
      %cst_17 = arith.constant dense<0xFF800000> : vector<4xf32>
      %42 = vector.multi_reduction <maximumf>, %41, %cst_17 [1] : vector<4x128xf32> to vector<4xf32>
      %43 = vector.shape_cast %42 : vector<4xf32> to vector<4x1xf32>
      %44 = vector.broadcast %43 : vector<4x1xf32> to vector<4x128xf32>
      %45 = arith.subf %41, %44 : vector<4x128xf32>
      %46 = math.exp %45 : vector<4x128xf32>
      %cst_18 = arith.constant dense<0.000000e+00> : vector<4xf32>
      %47 = vector.multi_reduction <add>, %46, %cst_18 [1] : vector<4x128xf32> to vector<4xf32>
      %48 = vector.shape_cast %47 : vector<4xf32> to vector<4x1xf32>
      %49 = vector.broadcast %48 : vector<4x1xf32> to vector<4x128xf32>
      %50 = arith.divf %46, %49 : vector<4x128xf32>
      %51 = tpu.iota {dimensions = array<i32: 0>} : vector<128x128xi32>
      %52 = tpu.iota {dimensions = array<i32: 1>} : vector<128x128xi32>
      %53 = arith.cmpi sle, %51, %52 : vector<128x128xi32>
      %54 = arith.extui %53 : vector<128x128xi1> to vector<128x128xi32>
      %55 = arith.sitofp %54 : vector<128x128xi32> to vector<128x128xf32>
      %cst_19 = arith.constant dense<0.000000e+00> : vector<4x128xf32>
      %56 = tpu.matmul %50, %55, %cst_19 {dimension_numbers = #tpu.dot_dimension_numbers<[1], [0], [0], [1], [0, 0, 1, 1], [], []>} : vector<4x128xf32>, vector<128x128xf32>, vector<4x128xf32> -> vector<4x128xf32>
      %57 = vector.extract_strided_slice %56 {offsets = [0, 0], sizes = [4, 1], strides = [1, 1]} : vector<4x128xf32> to vector<4x1xf32>
      %cst_20 = arith.constant dense<0x7F800000> : vector<1xf32>
      %58 = vector.multi_reduction <minimumf>, %57, %cst_20 [0] : vector<4x1xf32> to vector<1xf32>
      %59 = vector.shape_cast %58 : vector<1xf32> to vector<1x1xf32>
      %60 = vector.broadcast %59 : vector<1x1xf32> to vector<4x1xf32>
      %61 = arith.maximumf %60, %33 : vector<4x1xf32>
      %62 = vector.broadcast %61 : vector<4x1xf32> to vector<4x128xf32>
      %63 = arith.cmpf ogt, %56, %62 : vector<4x128xf32>
      %c0_i32_21 = arith.constant 0 : i32
      %64 = vector.broadcast %c0_i32_21 : i32 to vector<4x128xi32>
      %65 = arith.cmpi sgt, %2, %64 : vector<4x128xi32>
      %66 = arith.andi %63, %65 : vector<4x128xi1>
      %cst_22 = arith.constant dense<true> : vector<4x128xi1>
      %67 = arith.xori %66, %cst_22 : vector<4x128xi1>
      %cst_23 = arith.constant 0.000000e+00 : f32
      %68 = vector.broadcast %cst_23 : f32 to vector<4x128xf32>
      %69 = arith.select %67, %50, %68 : vector<4x128xi1>, vector<4x128xf32>
      %70 = tpu.iota {dimensions = array<i32: 0>} : vector<128x128xi32>
      %71 = tpu.iota {dimensions = array<i32: 1>} : vector<128x128xi32>
      %72 = arith.cmpi sle, %70, %71 : vector<128x128xi32>
      %73 = arith.extui %72 : vector<128x128xi1> to vector<128x128xi32>
      %74 = arith.sitofp %73 : vector<128x128xi32> to vector<128x128xf32>
      %cst_24 = arith.constant dense<0.000000e+00> : vector<4x128xf32>
      %75 = tpu.matmul %69, %74, %cst_24 {dimension_numbers = #tpu.dot_dimension_numbers<[1], [0], [0], [1], [0, 0, 1, 1], [], []>} : vector<4x128xf32>, vector<128x128xf32>, vector<4x128xf32> -> vector<4x128xf32>
      %76 = vector.extract_strided_slice %75 {offsets = [0, 127], sizes = [4, 1], strides = [1, 1]} : vector<4x128xf32> to vector<4x1xf32>
      %77 = vector.broadcast %76 : vector<4x1xf32> to vector<4x128xf32>
      %78 = arith.divf %75, %77 : vector<4x128xf32>
      %cst_25 = arith.constant 5.000000e-01 : f32
      %79 = vector.broadcast %cst_25 : f32 to vector<4x1xf32>
      %80 = vector.broadcast %79 : vector<4x1xf32> to vector<4x128xf32>
      %81 = arith.cmpf ogt, %80, %78 : vector<4x128xf32>
      %82 = arith.extui %81 : vector<4x128xi1> to vector<4x128xi32>
      %cst_26 = arith.constant dense<0> : vector<4xi32>
      %83 = vector.multi_reduction <add>, %82, %cst_26 [1] : vector<4x128xi32> to vector<4xi32>
      %84 = vector.shape_cast %83 : vector<4xi32> to vector<4x1xi32>
      %c127_i32 = arith.constant 127 : i32
      %85 = vector.broadcast %c127_i32 : i32 to vector<4x1xi32>
      %86 = arith.minsi %84, %85 : vector<4x1xi32>
      %87 = vector.broadcast %86 : vector<4x1xi32> to vector<4x128xi32>
      %88 = arith.cmpi eq, %2, %87 : vector<4x128xi32>
      %c0_i32_27 = arith.constant 0 : i32
      %89 = vector.broadcast %c0_i32_27 : i32 to vector<4x128xi32>
      %90 = arith.select %88, %31, %89 : vector<4x128xi1>, vector<4x128xi32>
      %cst_28 = arith.constant dense<0> : vector<4xi32>
      %91 = vector.multi_reduction <add>, %90, %cst_28 [1] : vector<4x128xi32> to vector<4xi32>
      %92 = vector.shape_cast %91 : vector<4xi32> to vector<4x1xi32>
      %c0_29 = arith.constant 0 : index
      %c0_30 = arith.constant 0 : index
      %93 = vector.load %arg4[%c0_29, %c0_30] : memref<4x1xi32, #tpu.memory_space<vmem>>, vector<4x1xi32>
      tpu.vector_store %arg4[%c0_29, %c0_30], %92 {strides = array<i32>} : memref<4x1xi32, #tpu.memory_space<vmem>>, vector<4x1xi32>,
    } else {
    }
    return
  }
  func.func @transform_0(%arg0: i32) -> (i32, i32) {
    %c0_i32 = arith.constant 0 : i32
    %c0_i32_0 = arith.constant 0 : i32
    return %c0_i32, %arg0 : i32, i32
  }
  func.func @transform_1(%arg0: i32) -> (i32, i32) {
    %c0_i32 = arith.constant 0 : i32
    %c0_i32_0 = arith.constant 0 : i32
    %c0_i32_1 = arith.constant 0 : i32
    return %c0_i32, %c0_i32_0 : i32, i32
  }
  func.func @transform_2(%arg0: i32) -> i32 {
    %c0_i32 = arith.constant 0 : i32
    %c0_i32_0 = arith.constant 0 : i32
    return %c0_i32 : i32
  }
  func.func @transform_3(%arg0: i32) -> (i32, i32) {
    %c0_i32 = arith.constant 0 : i32
    %c0_i32_0 = arith.constant 0 : i32
    %c0_i32_1 = arith.constant 0 : i32
    return %c0_i32, %c0_i32_0 : i32, i32
  }
}

</mosaic_0001>

<bundles_post_ra>
// kernel: tpu_custom_call.1
= control target key start
LH: loop header
LB: loop body
LE: loop exit
PB: predicated region body
PF: predicated region fallthrough
CT: control target
= control target key end

     0   :  { %9 = vsyncpa [#allocation6], 0  ;;  %s1297_s0 = inlined_call_operand.hbm [shape: f32[4,500], index: 0, kind: input, shape index: {}]   ;;  %s1298_s1 = inlined_call_operand.hbm [shape: f32[4,3], index: 1, kind: input, shape index: {}]   ;;  %s1299_s2 = inlined_call_operand.<no memory space> [shape: s32[1], index: 2, kind: input, shape index: {}]   ;;  %s1300_s3 = inlined_call_operand.vmem [shape: s32[4,1], index: 3, kind: output, shape index: {}]  }
   0x1   :  { %11 = vsyncpa [#allocation6 + $0x1], 0 }
   0x2   :  { %12 = vsyncpa [#allocation8], 0  ;;  %s1035_s12 = smov 0   ;;  %s1037_s13 = smov 0  }
   0x3   :  { %s1039_s14 = smov 0   ;;  %s1041_s15 = smov 0  }
   0x4 LB: > { %s1054_s2 = sadd.s32 4294967295, %s972_s15   ;;  %p38_p0 = scmp.ne.s32.totalorder %s964_s13, %s960_s12  ;;  %s972_s15 = sphi %s1041_s15, %s1313_s15   ;;  %s968_s14 = sphi %s1039_s14, %s1312_s14   ;;  %s964_s13 = sphi %s1037_s13, %s1311_s13   ;;  %s960_s12 = sphi %s1035_s12, %s1310_s12  }
   0x5   : > { %p39_p1 = scmp.eq.s32.totalorder %s1054_s2, 0  ;;  %p638_p2 = scmp.ge.s32.totalorder %s972_s15, 1 }
   0x6   : > { %p112_p3 = scmp.lt.s32.totalorder %s972_s15, 3  ;;  %p639_p4 = scmp.ne.s32.totalorder %s1054_s2, 0 }
   0x7   : > { %p1063_p5 = por %p39_p1, %p38_p0  ;;  %s124_s19 = sshll.u32 %s1298_s1, 4  ;;  %s125_s19 = int_to_ptr.hbm [resolvable:$true] %s124_s19 }
   0x8   : > { %p1070_p6 = pnand %p638_p2, %p112_p3  ;;  %s1002_s21 = smov [#allocation7]  }
   0x9   : > { %s126_s22 = sshll.u32 %s1002_s21, 4  ;;  %s1079_s23 = sadd.s32 1, %s972_s15   ;;  %s127_s22 = int_to_ptr.vmem [resolvable:$true] %s126_s22 }
   0xa   : > { %p720_p7 = pneg %p1070_p6  ;;  %s25_s24 = sadd.s32 1, %s968_s14 }
   0xb   : > { %s22_s25 = ssub.s32 %s972_s15, %s1079_s23  ;;  %p32_p10 = scmp.ne.s32.totalorder %s968_s14, %s964_s13 }
   0xc   : > { %p721_p8 = pnand %p720_p7, %p39_p1  ;;  %p23_p9 = scmp.eq.s32.totalorder %s22_s25, 0 }
   0xd   : > { %p33_p11 = scmp.eq.s32.totalorder %s972_s15, 0  ;;  %p729_p12 = scmp.lt.s32.totalorder %s972_s15, 2 }
   0xe   : > { %723 = dma.hbm_to_vmem [thread:$0]  (!%p721_p8), %s125_s19, 64, %s127_s22, [#allocation8]  }
   0xf   : > { %s1089_s26 = scalar_select %p23_p9, %s968_s14, %s25_s24  }
  0x10   : > { %p34_p13 = por %p33_p11, %p32_p10  ;;  %s140_s27 = sand.u32 1, %s968_s14  }
  0x11   : > { %s641_s28 = sshll.u32 %s140_s27, 3  ;;  %s707_s29 = sshll.u32 %s972_s15, 3 }
  0x12   : > { %s149_s5 = scalar_lea.hbm %s1297_s0, %s707_s29  ;;  %s144_s6 = scalar_lea.vmem [#allocation5], %s641_s28 }
  0x13   : > { %s153_s7 = sshll.u32 %s144_s6, 4  ;;  %s151_s8 = sshll.u32 %s149_s5, 4  ;;  %s154_s7 = int_to_ptr.vmem [resolvable:$true] %s153_s7  ;;  %s152_s8 = int_to_ptr.hbm [resolvable:$true] %s151_s8 }
  0x14   : > { %p1096_p0 = pnand %p729_p12, %p34_p13  ;;  %s141_s10 = scalar_lea.sflag [#allocation6], %s140_s27 }
  0x15   : > { %s876_s11 = sshra.s32 %s152_s8, 4  ;;  %s883_s18 = scalar_lea.hbm %s1297_s0, 16  ;;  %s877_s11 = int_to_ptr.hbm [resolvable:$true] %s876_s11 }
  0x16   : > { %s878_s12 = scalar_lea.hbm %s877_s11, 8  ;;  %p880_p3 = pneg %p1096_p0 }
  0x17   : > { %p879_p2 = scmp.ne.s32.totalorder %s877_s11, %s878_s12  ;;  %p884_p9 = scmp.lt.s32.totalorder %s877_s11, %s1297_s0 }
  0x18   : > { %p885_p10 = scmp.lt.s32.totalorder %s883_s18, %s878_s12 }
  0x19   : > { %p881_p7 = pnand %p880_p3, %p879_p2 }
  0x1a   : > { %p886_p11 = por %p885_p10, %p884_p9 }
  0x1b   : > { %p882_p8 = pneg %p881_p7 }
  0x1d   : > { %p887_p12 = pnand %p886_p11, %p882_p8 }
  0x1f   : > { %890 = shalt.err (!%p887_p12)
}
  0x20   : > { %727 = dma.hbm_to_vmem [thread:$0]  (!%p1096_p0), %s152_s8, 128, %s154_s7, %s141_s10  }
  0x21   : > { %162 = sbr.rel (%p1070_p6) target bundleno = 1919 (0x77f), region = 32  ;;  %s164_s22 = sand.u32 (!%p1070_p6), 1, %s964_s13  }
  0x22   : > { %s645_s24 = sshll.u32 (!%p1070_p6), %s164_s22, 3  ;;  %s165_s25 = scalar_lea.sflag (!%p1070_p6), [#allocation6], %s164_s22 }
  0x23   : > { %s168_s27 = scalar_lea.vmem (!%p1070_p6), [#allocation5], %s645_s24 }
  0x26   : > { %951 = dma.done.wait (%p1063_p5), %s165_s25, 128  }
  0x27   : > { %953 = vsyncadd (%p1063_p5), %s165_s25, 4294967168 }
  0x28   : > { %955 = dma.done.wait (%p39_p1), [#allocation8], 64  }
  0x29   : > { %957 = vsyncadd (%p39_p1), [#allocation8], 4294967232  ;;  %v194_v0 = vlaneseq  ;;  %s647_s20 = sshll.u32 %s1054_s2, 8  ;;  %v193_v4 = vld [vmem:[%s168_s27] sm:$0xff] }
  0x2a   : > { %v1128_v3 = vstv %s647_s20  ;;  %204 = vst [vmem:[#allocation1] ss:$2 sm:$0xff] %v193_v4 }
  0x2b   : > { %v1122_v1 = vand.u32 127, %v194_v0 }
  0x2d   : > { %v1126_v2 = vadd.s32 128, %v1122_v1  ;;  %v199_v5 = vadd.s32 %v1128_v3, %v1122_v1 }
  0x2f   : > { %v200_v6 = vadd.s32 %v1128_v3, %v1126_v2  ;;  %vm201_vm0 = vcmp.lt.s32.totalorder %v199_v5, 500  ;;  %214 = sbr.rel (%p639_p4) target bundleno = 55 (0x37), region = 44 }
  0x31   : > { %vm202_vm1 = vcmp.lt.s32.totalorder %v200_v6, 500  ;;  %v205_v7 = vld.sshfl [vmem:[#allocation1] sm:$0xff pattern:$0x75316420] }
  0x32   : > { %v206_v8 = vld.sshfl [vmem:[#allocation1 + $0x8] sm:$0xff pattern:$0x75316420]  ;;  %v209_v9 = vsel %vm201_vm0, %v205_v7, -inf  }
  0x33   : > { %v210_v10 = vsel %vm202_vm1, %v206_v8, -inf  }
  0x34   : > { %v1003_v11 = vmov -inf   ;;  %v1004_v12 = vmov 0  }
  0x35   : > { %215 = vst [vmem:[#allocation2] sm:$0xf] %v1003_v11 }
  0x36   : > { %216 = vst [vmem:[#allocation3] sm:$0xf] %v1004_v12 }
  0x37 PF: > { %v1005_v14 = vmov 127   ;;  %vm227_vm2 = vcmask 1043456   ;;  %v1006_v16 = vmov 0  }
  0x38   : > { %832 = vset.pattern.permute.xlu0 %v1005_v14 }
  0x3c   : > { %v217_v13 = vld [vmem:[#allocation2] sm:$0xf] }
  0x3d   : > { %220 = vperm.xlu0 %832, %v217_v13  }
  0xaf   : > { %v221_v15 = vpop.permute.xlu0 %220 }
  0xb0   : > { %vm223_vm3 = vcmp.gt.f32.partialorder %v209_v9, %v221_v15  ;;  %vm224_vm4 = vcmp.gt.f32.partialorder %v210_v10, %v221_v15 }
  0xb1   : > { %v225_v17 = vsel %vm223_vm3, 1, %v1006_v16  ;;  %v226_v18 = vsel %vm224_vm4, 1, %v1006_v16 }
  0xb2   : > { %v228_v19 = vsel %vm227_vm2, %v225_v17, 0  ;;  %v229_v20 = vsel %vm227_vm2, %v226_v18, 0 }
  0xb3   : > { %v230_v21 = vadd.s32 %v229_v20, %v228_v19 }
  0xb5   : > { %v232_v22 = vshrl.u32 %v230_v21, 16  ;;  %v231_v23 = vand.u32 65535, %v230_v21 }
  0xb7   : > { %v234_v24 = vcvt.s32.f32 %v232_v22  ;;  %v233_v25 = vcvt.s32.f32 %v231_v23 }
  0xb9   : > { %237 = vadd.xlane.f32.xlu0 %v234_v24  ;;  %235 = vadd.xlane.f32.xlu1 %v233_v25 }
 0x12c   : > { %v238_v26 = vpop.xlane.xlu0 %237  ;;  %v236_v27 = vpop.xlane.xlu1 %235 }
 0x12d   : > { %v240_v28 = vcvt.f32.s32 %v238_v26  ;;  %v239_v30 = vcvt.f32.s32 %v236_v27 }
 0x12f   : > { %v241_v29 = vshll.u32 %v240_v28, 16 }
 0x131   : > { %v242_v31 = vadd.s32 %v241_v29, %v239_v30 }
 0x133   : > { %v243_v32 = vsel %vm227_vm2, %v242_v31, 2147483648 }
 0x134   : > { %v244_v33 = vrot.slane %v243_v32, 4 }
 0x136   : > { %vm245_vm5 = vcmp.gt.s32.totalorder %v243_v32, %v244_v33 }
 0x137   : > { %v246_v34 = vsel %vm245_vm5, %v243_v32, %v244_v33 }
 0x138   : > { %v247_v35 = vrot.slane %v246_v34, 2 }
 0x13a   : > { %vm248_vm6 = vcmp.gt.s32.totalorder %v246_v34, %v247_v35 }
 0x13b   : > { %v249_v36 = vsel %vm248_vm6, %v246_v34, %v247_v35 }
 0x13c   : > { %v250_v37 = vrot.slane %v249_v36, 1 }
 0x13e   : > { %vm251_vm7 = vcmp.gt.s32.totalorder %v249_v36, %v250_v37 }
 0x13f   : > { %v252_v38 = vsel %vm251_vm7, %v249_v36, %v250_v37 }
 0x140   : > { %712 = vpush %v252_v38 }
 0x171   : > { %s713_s16 = spop %712 }
 0x172   : > { %p254_p1 = scmp.lt.s32.totalorder %s713_s16, 128  ;;  %p649_p4 = scmp.gt.s32.totalorder %s713_s16, 0 }
 0x173   : > { %v260_v39 = vld [vmem:[#allocation2] sm:$0xf] (%p649_p4)   ;;  %v261_v40 = vld [vmem:[#allocation3] sm:$0xf] (%p649_p4)   ;;  %p709_p5 = scmp.le.s32.totalorder (%p649_p4), %s713_s16, 0 }
 0x174   : > { %s1139_s28 = scalar_select %p254_p1, %s713_s16, 128  ;;  %v1304_v41 = vmov (%p649_p4), %v261_v40  ;;  %v1305_v42 = vmov (%p649_p4), %v260_v39 }
 0x175   : > { %259 = sbr.rel (!%p649_p4) target bundleno = 756 (0x2f4), region = 48 }
 0x17a   : > { %603 = sbr.rel (%p709_p5) target bundleno = 754 (0x2f2), region = 85  ;;  %s1153_s29 = smov (!%p709_p5), 0  }
 0x17f LB: >> { %v272_v43 = vsel %vm227_vm2, %v980_v9, -inf  ;;  %v273_v44 = vsel %vm227_vm2, %v976_v10, -inf  ;;  %v1007_v47 = vmov 0   ;;  %s1008_s30 = smov 1   ;;  %s265_s29 = sadd.s32 1, %s992_s29   ;;  %s992_s29 = sphi %s1153_s29, %s265_s29   ;;  %v988_v39 = vphi %v260_v39, %v1307_v39   ;;  %v984_v40 = vphi %v261_v40, %v1306_v40   ;;  %v980_v9 = vphi %v209_v9, %v329_v9   ;;  %v976_v10 = vphi %v210_v10, %v330_v10  }
 0x180   : >> { %v274_v45 = vmax.f32 %v272_v43, %v273_v44  ;;  %p264_p6 = scmp.ge.s32.totalorder %s265_s29, %s1139_s28 }
 0x182   : >> { %275 = vmax.xlane.f32.xlu0 %v274_v45 }
 0x1f5   : >> { %v276_v46 = vpop.xlane.xlu0 %275 }
 0x1f6   : >> { %vm300_vm8 = vcmp.ge.f32.partialorder %v988_v39, %v276_v46  ;;  %vm277_vm9 = vcmp.eq.f32.partialorder %v980_v9, %v276_v46  ;;  %vm278_vm10 = vcmp.eq.f32.partialorder %v976_v10, %v276_v46 }
 0x1f7   : >> { %v301_v48 = vsel %vm300_vm8, 1, %v1007_v47  ;;  %v279_v49 = vsel %vm277_vm9, %v1122_v1, 256  ;;  %v280_v50 = vsel %vm278_vm10, %v1126_v2, 256 }
 0x1f8   : >> { %v302_v51 = vsel %vm227_vm2, %v301_v48, 0  ;;  %v281_v52 = vsel %vm227_vm2, %v279_v49, 2147483647  ;;  %v282_v53 = vsel %vm227_vm2, %v280_v50, 2147483647 }
 0x1f9   : >> { %v304_v54 = vshrl.u32 %v302_v51, 16  ;;  %v303_v55 = vand.u32 65535, %v302_v51  ;;  %vm283_vm11 = vcmp.lt.s32.totalorder %v281_v52, %v282_v53 }
 0x1fa   : >> { %v284_v56 = vsel %vm283_vm11, %v281_v52, %v282_v53 }
 0x1fb   : >> { %v306_v57 = vcvt.s32.f32 %v304_v54  ;;  %v305_v58 = vcvt.s32.f32 %v303_v55  ;;  %v286_v59 = vshra.s32 %v284_v56, 16  ;;  %v285_v61 = vand.u32 65535, %v284_v56 }
 0x1fd   : >> { %309 = vadd.xlane.f32.xlu1 %v306_v57  ;;  %307 = vadd.xlane.f32.xlu2 %v305_v58  ;;  %v288_v60 = vcvt.s32.f32 %v286_v59  ;;  %v287_v6 = vcvt.s32.f32 %v285_v61 }
 0x1ff   : >> { %289 = vmin.xlane.f32.xlu0 %v288_v60 }
 0x213   : >> { %319 = vrot.lane.b32.xlu0 %v984_v40, %s1008_s30 }
 0x215   : >> { %316 = vrot.lane.b32.xlu2 %v988_v39, %s1008_s30 }
 0x270   : >> { %v310_v62 = vpop.xlane.xlu1 %309  ;;  %v308_v63 = vpop.xlane.xlu2 %307 }
 0x271   : >> { %v312_v4 = vcvt.f32.s32 %v310_v62  ;;  %v311_v8 = vcvt.f32.s32 %v308_v63 }
 0x272   : >> { %v290_v5 = vpop.xlane.xlu0 %289 }
 0x273   : >> { %v313_v7 = vshll.u32 %v312_v4, 16  ;;  %vm291_vm12 = vcmp.eq.f32.partialorder %v288_v60, %v290_v5  ;;  %v296_v16 = vcvt.f32.s32 %v290_v5 }
 0x274   : >> { %v292_v11 = vsel %vm291_vm12, %v287_v6, inf }
 0x275   : >> { %v314_v12 = vadd.s32 %v313_v7, %v311_v8  ;;  %293 = vmin.xlane.f32.xlu1 %v292_v11  ;;  %v297_v18 = vshll.u32 %v296_v16, 16 }
 0x277   : >> { %vm322_vm13 = vcmp.eq.s32.totalorder %v1122_v1, %v314_v12  ;;  %vm321_vm14 = vcmp.lt.s32.totalorder %v1122_v1, %v314_v12 }
 0x278   : >> { %v317_v13 = vpop.permute.xlu2 %316 }
 0x279   : >> { %v323_v14 = vsel %vm322_vm13, %v276_v46, %v317_v13 }
 0x27a   : >> { %v324_v15 = vsel %vm321_vm14, %v988_v39, %v323_v14  }
 0x27b   : >> { %v1307_v39 = vmov %v324_v15  ;;  %v1309_v42 = vmov (%p264_p6), %v324_v15 }
 0x285   : >> { %v320_v21 = vpop.permute.xlu0 %319 }
 0x2e8   : >> { %v294_v17 = vpop.xlane.xlu1 %293 }
 0x2e9   : >> { %v295_v19 = vcvt.f32.s32 %v294_v17 }
 0x2eb   : >> { %v298_v20 = vadd.s32 %v297_v18, %v295_v19 }
 0x2ed   : >> { %vm327_vm15 = vcmp.eq.s32.totalorder %v1122_v1, %v298_v20  ;;  %vm328_vm0 = vcmp.eq.s32.totalorder %v1126_v2, %v298_v20  ;;  %v299_v22 = vadd.s32 %v298_v20, %v1128_v3  ;;  %267 = sbr.rel (!%p264_p6) target bundleno = 383 (0x17f), region = 91 }
 0x2ee   : >> { %v329_v9 = vsel %vm327_vm15, -inf, %v980_v9   ;;  %v330_v10 = vsel %vm328_vm0, -inf, %v976_v10  }
 0x2ef   : >> { %v325_v23 = vsel %vm322_vm13, %v299_v22, %v320_v21 }
 0x2f0   : >> { %v326_v24 = vsel %vm321_vm14, %v984_v40, %v325_v23  }
 0x2f1   : >> { %v1306_v40 = vmov %v326_v24  ;;  %v1308_v41 = vmov (%p264_p6), %v326_v24 }
 0x2f2 PF: > { %331 = vst [vmem:[#allocation2] sm:$0xf] %v1000_v42  ;;  %v1000_v42 = vphi %v1305_v42, %v1309_v42   ;;  %v996_v41 = vphi %v1304_v41, %v1308_v41  }
 0x2f3   : > { %332 = vst [vmem:[#allocation3] sm:$0xf] %v996_v41 }
 0x2f4 PF: > { %p654_p13 = scmp.ne.s32.totalorder %s1054_s2, 1 }
 0x2f5   : > { %s1012_s2 = smov (!%p654_p13), 127  }
 0x2f6   : > { %336 = sbr.rel (%p654_p13) target bundleno = 1919 (0x77f), region = 59 }
 0x2fb   : > { %v1197_v25 = vld [vmem:[#allocation7] sm:$0xf]  ;;  %v1009_v26 = vmov 2   ;;  %v1010_v2 = vmov 0   ;;  %v340_v27 = vcvt.s32.f32 %v1122_v1  ;;  %v337_v32 = vld [vmem:[#allocation2] sm:$0xf] }
 0x2fc   : > { %833 = vset.pattern.permute.xlu0 %v1009_v26  ;;  %835 = vset.pattern.permute.xlu2 %v1010_v2  ;;  %v1206_v41 = vshrl.u32 %v194_v0, 7  ;;  %v1011_v46 = vmov 1.0   ;;  %v1013_v26 = vmov 127  }
 0x2fd   : > { %349 = vperm.xlu0 %833, %v1197_v25   ;;  %484 = vrot.lane.b32.xlu2 %v1197_v25, %s1012_s2 }
 0x2fe   : > { %v407_v42 = vadd.s32 120, %v1206_v41  ;;  %v406_v43 = vadd.s32 112, %v1206_v41  ;;  %v405_v44 = vadd.s32 104, %v1206_v41  ;;  %v404_v45 = vadd.s32 96, %v1206_v41  ;;  %836 = vset.pattern.permute.xlu1 %v1013_v26 }
 0x2ff   : > { %v403_v0 = vadd.s32 88, %v1206_v41  ;;  %v402_v47 = vadd.s32 80, %v1206_v41  ;;  %v401_v53 = vadd.s32 72, %v1206_v41  ;;  %v400_v54 = vadd.s32 64, %v1206_v41 }
 0x300   : > { %vm423_vm7 = vcmp.le.s32.totalorder %v407_v42, %v1122_v1  ;;  %vm422_vm8 = vcmp.le.s32.totalorder %v406_v43, %v1122_v1  ;;  %vm421_vm9 = vcmp.le.s32.totalorder %v405_v44, %v1122_v1  ;;  %vm420_vm10 = vcmp.le.s32.totalorder %v404_v45, %v1122_v1 }
 0x301   : > { %671 = vmatpush.msk.msra.mxu0 %vm423_vm7, %v1011_v46  ;;  %687 = vmatpush.msk.msra.mxu1 %vm423_vm7, %v1011_v46  ;;  %vm419_vm11 = vcmp.le.s32.totalorder %v403_v0, %v1122_v1  ;;  %vm418_vm12 = vcmp.le.s32.totalorder %v402_v47, %v1122_v1  ;;  %vm417_vm13 = vcmp.le.s32.totalorder %v401_v53, %v1122_v1  ;;  %v399_v55 = vadd.s32 56, %v1206_v41 }
 0x302   : > { %vm416_vm14 = vcmp.le.s32.totalorder %v400_v54, %v1122_v1  ;;  %v398_v56 = vadd.s32 48, %v1206_v41  ;;  %v397_v57 = vadd.s32 40, %v1206_v41  ;;  %v396_v58 = vadd.s32 32, %v1206_v41 }
 0x303   : > { %672 = vmatpush.msk.msra.mxu0 %vm422_vm8, %v1011_v46  ;;  %688 = vmatpush.msk.msra.mxu1 %vm422_vm8, %v1011_v46  ;;  %vm415_vm15 = vcmp.le.s32.totalorder %v399_v55, %v1122_v1  ;;  %v395_v59 = vadd.s32 24, %v1206_v41  ;;  %v394_v60 = vadd.s32 16, %v1206_v41  ;;  %v393_v61 = vadd.s32 8, %v1206_v41 }
 0x304   : > { %vm414_vm0 = vcmp.le.s32.totalorder %v398_v56, %v1122_v1  ;;  %vm408_vm7 = vcmp.le.s32.totalorder %v1206_v41, %v1122_v1 }
 0x305   : > { %834 = vset.pattern.permute.xlu0 %v1010_v2  ;;  %673 = vmatpush.msk.msra.mxu0 %vm421_vm9, %v1011_v46 }
 0x306   : > { %343 = vperm.xlu0 %834, %v1197_v25   ;;  %689 = vmatpush.msk.msra.mxu1 %vm421_vm9, %v1011_v46 }
 0x307   : > { %674 = vmatpush.msk.msra.mxu0 %vm420_vm10, %v1011_v46 }
 0x308   : > { %690 = vmatpush.msk.msra.mxu1 %vm420_vm10, %v1011_v46 }
 0x309   : > { %675 = vmatpush.msk.msra.mxu0 %vm419_vm11, %v1011_v46 }
 0x30a   : > { %691 = vmatpush.msk.msra.mxu1 %vm419_vm11, %v1011_v46 }
 0x30b   : > { %676 = vmatpush.msk.msra.mxu0 %vm418_vm12, %v1011_v46 }
 0x30c   : > { %692 = vmatpush.msk.msra.mxu1 %vm418_vm12, %v1011_v46  ;;  %vm476_vm12 = vcmask 3072  }
 0x30d   : > { %677 = vmatpush.msk.msra.mxu0 %vm417_vm13, %v1011_v46 }
 0x30e   : > { %693 = vmatpush.msk.msra.mxu1 %vm417_vm13, %v1011_v46  ;;  %837 = vset.pattern.permute.xlu0 %v1013_v26  ;;  %vm494_vm13 = vcmp.gt.s32.totalorder %v1122_v1, 0 }
 0x30f   : > { %678 = vmatpush.msk.msra.mxu0 %vm416_vm14, %v1011_v46 }
 0x310   : > { %694 = vmatpush.msk.msra.mxu1 %vm416_vm14, %v1011_v46 }
 0x311   : > { %679 = vmatpush.msk.msra.mxu0 %vm415_vm15, %v1011_v46 }
 0x312   : > { %695 = vmatpush.msk.msra.mxu1 %vm415_vm15, %v1011_v46 }
 0x313   : > { %680 = vmatpush.msk.msra.mxu0 %vm414_vm0, %v1011_v46 }
 0x314   : > { %696 = vmatpush.msk.msra.mxu1 %vm414_vm0, %v1011_v46  ;;  %vm1014_vm0 = vmmov 1  }
 0x357   : > { %v485_v23 = vpop.permute.xlu2 %484 }
 0x36f   : > { %v350_v3 = vpop.permute.xlu0 %349 }
 0x370   : > { %838 = vrcp.f32 %v350_v3  ;;  %v363_v30 = vand.u32 2147483648, %v350_v3  ;;  %v361_v33 = vand.u32 2147483647, %v350_v3  ;;  %vm357_vm4 = vweird.f32 %v350_v3 }
 0x372   : > { %v364_v36 = vor.u32 1.1754944e-38, %v363_v30  ;;  %vm362_vm6 = vcmp.eq.f32.partialorder %v361_v33, 8.507059e+37 }
 0x376   : > { %v839_v9 = vpop.eup %838 }
 0x377   : > { %v353_v10 = vmul.f32 %v839_v9, %v350_v3  ;;  %vm358_vm3 = vweird.f32 %v839_v9 }
 0x378   : > { %v344_v28 = vpop.permute.xlu0 %343  ;;  %vm359_vm5 = vmor %vm357_vm4, %vm358_vm3  ;;  %vm412_vm3 = vcmp.le.s32.totalorder %v396_v58, %v1122_v1  ;;  %vm411_vm4 = vcmp.le.s32.totalorder %v395_v59, %v1122_v1 }
 0x379   : > { %v354_v29 = vsub.f32 1.0, %v353_v10  ;;  %vm346_vm1 = vcmp.ge.f32.partialorder %v340_v27, %v344_v28 }
 0x37a   : > { %v347_v35 = vsel %vm346_vm1, -3000.0, %v337_v32  ;;  %vm413_vm1 = vcmp.le.s32.totalorder %v397_v57, %v1122_v1 }
 0x37b   : > { %v355_v31 = vmul.f32 %v839_v9, %v354_v29  ;;  %681 = vmatpush.msk.msra.mxu0 %vm413_vm1, %v1011_v46  ;;  %697 = vmatpush.msk.msra.mxu1 %vm413_vm1, %v1011_v46 }
 0x37d   : > { %v356_v34 = vadd.f32 %v839_v9, %v355_v31  ;;  %682 = vmatpush.msk.msra.mxu0 %vm412_vm3, %v1011_v46  ;;  %698 = vmatpush.msk.msra.mxu1 %vm412_vm3, %v1011_v46 }
 0x37f   : > { %v360_v37 = vsel %vm359_vm5, %v839_v9, %v356_v34  ;;  %683 = vmatpush.msk.msra.mxu0 %vm411_vm4, %v1011_v46  ;;  %699 = vmatpush.msk.msra.mxu1 %vm411_vm4, %v1011_v46  ;;  %vm410_vm5 = vcmp.le.s32.totalorder %v394_v60, %v1122_v1 }
 0x380   : > { %v365_v38 = vsel %vm362_vm6, %v364_v36, %v360_v37  ;;  %vm409_vm6 = vcmp.le.s32.totalorder %v393_v61, %v1122_v1 }
 0x381   : > { %v366_v39 = vmul.f32 %v365_v38, %v347_v35  ;;  %684 = vmatpush.msk.msra.mxu0 %vm410_vm5, %v1011_v46  ;;  %700 = vmatpush.msk.msra.mxu1 %vm410_vm5, %v1011_v46 }
 0x383   : > { %v367_v40 = vsel %vm227_vm2, %v366_v39, -inf  ;;  %685 = vmatpush.msk.msra.mxu0 %vm409_vm6, %v1011_v46  ;;  %701 = vmatpush.msk.msra.mxu1 %vm409_vm6, %v1011_v46 }
 0x384   : > { %368 = vmax.xlane.f32.xlu1 %v367_v40 }
 0x385   : > { %686 = vmatpush.msk.msra.mxu0 %vm408_vm7, %v1011_v46  ;;  %702 = vmatpush.msk.msra.mxu1 %vm408_vm7, %v1011_v46 }
 0x3f7   : > { %v369_v48 = vpop.xlane.xlu1 %368 }
 0x3f8   : > { %v370_v49 = vsub.f32 %v366_v39, %v369_v48 }
 0x3fa   : > { %v371_v50 = vmul.f32 1.442695, %v370_v49  ;;  %v338_v49 = vld [vmem:[#allocation3] sm:$0xf] }
 0x3fc   : > { %840 = vpow2.f32 %v371_v50 }
 0x402   : > { %v841_v51 = vpop.eup %840 }
 0x403   : > { %v373_v52 = vsel %vm227_vm2, %v841_v51, 0.0 }
 0x404   : > { %374 = vadd.xlane.f32.xlu1 %v373_v52 }
 0x477   : > { %v375_v62 = vpop.xlane.xlu1 %374 }
 0x478   : > { %842 = vrcp.f32 %v375_v62  ;;  %v387_v6 = vand.u32 2147483648, %v375_v62  ;;  %v385_v8 = vand.u32 2147483647, %v375_v62  ;;  %vm381_vm9 = vweird.f32 %v375_v62 }
 0x47a   : > { %v388_v12 = vor.u32 1.1754944e-38, %v387_v6  ;;  %vm386_vm11 = vcmp.eq.f32.partialorder %v385_v8, 8.507059e+37 }
 0x47e   : > { %v843_v63 = vpop.eup %842 }
 0x47f   : > { %v377_v4 = vmul.f32 %v843_v63, %v375_v62  ;;  %vm382_vm8 = vweird.f32 %v843_v63 }
 0x480   : > { %vm383_vm10 = vmor %vm381_vm9, %vm382_vm8 }
 0x481   : > { %v378_v5 = vsub.f32 1.0, %v377_v4 }
 0x483   : > { %v379_v7 = vmul.f32 %v843_v63, %v378_v5 }
 0x485   : > { %v380_v11 = vadd.f32 %v843_v63, %v379_v7 }
 0x487   : > { %v384_v13 = vsel %vm383_vm10, %v843_v63, %v380_v11 }
 0x488   : > { %v389_v14 = vsel %vm386_vm11, %v388_v12, %v384_v13 }
 0x489   : > { %v390_v15 = vmul.f32 %v841_v51, %v389_v14 }
 0x48b   : > { %472 = vmatmul.f32.vlgmr.msra.gmra.mxu0 %v390_v15 }
 0x508   : > { %v473_v16 = vpop.f32.mrf.mxu0 }
 0x509   : > { %v477_v17 = vsel %vm476_vm12, %v473_v16, inf }
 0x50a   : > { %v478_v18 = vrot.slane %v477_v17, 4 }
 0x50c   : > { %v479_v19 = vmin.f32 %v477_v17, %v478_v18 }
 0x50e   : > { %v480_v20 = vrot.slane %v479_v19, 2 }
 0x510   : > { %v481_v21 = vmin.f32 %v479_v19, %v480_v20 }
 0x512   : > { %v482_v22 = vrot.slane %v481_v21, 1 }
 0x514   : > { %v483_v24 = vmin.f32 %v481_v21, %v482_v22 }
 0x516   : > { %v487_v25 = vmax.f32 %v483_v24, %v485_v23 }
 0x518   : > { %490 = vperm.xlu2 %835, %v487_v25  }
 0x572   : > { %v491_v3 = vpop.permute.xlu2 %490 }
 0x573   : > { %vm493_vm14 = vcmp.gt.f32.partialorder %v473_v16, %v491_v3 }
 0x574   : > { %vm495_vm15 = vmand %vm493_vm14, %vm494_vm13 }
 0x575   : > { %vm496_vm1 = vmxor %vm495_vm15, %vm1014_vm0 }
 0x576   : > { %703 = vmatmul.msk.f32.vlgmr.msra.gmra.mxu1 %vm496_vm1, %v390_v15 }
 0x5f3   : > { %v515_v9 = vpop.f32.mrf.mxu1 }
 0x5f4   : > { %520 = vperm.xlu1 %836, %v515_v9  }
 0x666   : > { %v521_v10 = vpop.permute.xlu1 %520 }
 0x667   : > { %844 = vrcp.f32 %v521_v10  ;;  %v534_v30 = vand.u32 2147483648, %v521_v10  ;;  %v532_v32 = vand.u32 2147483647, %v521_v10  ;;  %vm528_vm4 = vweird.f32 %v521_v10 }
 0x669   : > { %v535_v34 = vor.u32 1.1754944e-38, %v534_v30  ;;  %vm533_vm6 = vcmp.eq.f32.partialorder %v532_v32, 8.507059e+37 }
 0x66d   : > { %v845_v27 = vpop.eup %844 }
 0x66e   : > { %v524_v28 = vmul.f32 %v845_v27, %v521_v10  ;;  %vm529_vm3 = vweird.f32 %v845_v27 }
 0x66f   : > { %vm530_vm5 = vmor %vm528_vm4, %vm529_vm3 }
 0x670   : > { %v525_v29 = vsub.f32 1.0, %v524_v28 }
 0x672   : > { %v526_v31 = vmul.f32 %v845_v27, %v525_v29 }
 0x674   : > { %v527_v33 = vadd.f32 %v845_v27, %v526_v31 }
 0x676   : > { %v531_v35 = vsel %vm530_vm5, %v845_v27, %v527_v33 }
 0x677   : > { %v536_v36 = vsel %vm533_vm6, %v535_v34, %v531_v35 }
 0x678   : > { %v537_v37 = vmul.f32 %v536_v36, %v515_v9 }
 0x67a   : > { %vm704_vm7 = vcmp.lt.f32.partialorder %v537_v37, 0.5 }
 0x67b   : > { %v539_v38 = vsel %vm704_vm7, 1, %v1010_v2 }
 0x67c   : > { %v540_v39 = vsel %vm227_vm2, %v539_v38, 0 }
 0x67d   : > { %v542_v40 = vshrl.u32 %v540_v39, 16  ;;  %v541_v41 = vand.u32 65535, %v540_v39 }
 0x67f   : > { %v544_v42 = vcvt.s32.f32 %v542_v40  ;;  %v543_v43 = vcvt.s32.f32 %v541_v41 }
 0x681   : > { %547 = vadd.xlane.f32.xlu2 %v544_v42  ;;  %545 = vadd.xlane.f32.xlu0 %v543_v43 }
 0x6f4   : > { %v548_v44 = vpop.xlane.xlu2 %547  ;;  %v546_v45 = vpop.xlane.xlu0 %545 }
 0x6f5   : > { %v550_v46 = vcvt.f32.s32 %v548_v44  ;;  %v549_v47 = vcvt.f32.s32 %v546_v45 }
 0x6f7   : > { %v551_v0 = vshll.u32 %v550_v46, 16 }
 0x6f9   : > { %v552_v48 = vadd.s32 %v551_v0, %v549_v47 }
 0x6fb   : > { %vm553_vm8 = vcmp.lt.s32.totalorder %v552_v48, 127 }
 0x6fc   : > { %v554_v50 = vsel %vm553_vm8, %v552_v48, 127 }
 0x6fd   : > { %vm555_vm9 = vcmp.eq.s32.totalorder %v1122_v1, %v554_v50 }
 0x6fe   : > { %v556_v2 = vsel %vm555_vm9, %v338_v49, 0 }
 0x6ff   : > { %v557_v51 = vsel %vm227_vm2, %v556_v2, 0 }
 0x700   : > { %v559_v52 = vshrl.u32 %v557_v51, 16  ;;  %v558_v53 = vand.u32 65535, %v557_v51 }
 0x702   : > { %v561_v54 = vcvt.s32.f32 %v559_v52  ;;  %v560_v55 = vcvt.s32.f32 %v558_v53 }
 0x704   : > { %564 = vadd.xlane.f32.xlu1 %v561_v54  ;;  %562 = vadd.xlane.f32.xlu2 %v560_v55 }
 0x777   : > { %v565_v56 = vpop.xlane.xlu1 %564  ;;  %v563_v57 = vpop.xlane.xlu2 %562 }
 0x778   : > { %v567_v58 = vcvt.f32.s32 %v565_v56  ;;  %v566_v60 = vcvt.f32.s32 %v563_v57 }
 0x77a   : > { %v568_v59 = vshll.u32 %v567_v58, 16 }
 0x77c   : > { %v569_v61 = vadd.s32 %v568_v59, %v566_v60 }
 0x77e   : > { %570 = vst.msk [vmem:[%s1300_s3] sm:$0xf] %vm476_vm12, %v569_v61 }
 0x77f PF: > { %p15_p0 = scmp.ge.s32.totalorder %s1079_s23, 4   ;;  %s1310_s12 = smov %s964_s13 }
 0x780   : > { %s1311_s13 = smov %s968_s14  ;;  %s1312_s14 = smov %s1089_s26 }
 0x781   : > { %s1313_s15 = smov %s1079_s23  ;;  %17 = sbr.rel (!%p15_p0) target bundleno = 4 (0x4), region = 102 }
 0x786   :  { %582 = vsyncpa [#allocation6], 1 }
 0x787   :  { %584 = vsyncpa [#allocation6 + $0x1], 1 }
 0x788   :  { %585 = vsyncpa [#allocation8], 1 }

</bundles_post_ra>
